<compile_context>
chip_gen: v5e
topology: v5e:2x2
jax: 0.10.0
libtpu: 0.0.40
codegen_flags: <defaults>
</compile_context>

<pallas_src>
import functools

import numpy as np
import jax
import jax.numpy as jnp
from jax.experimental import pallas as pl
from jax.experimental.pallas import tpu as pltpu


LANE = 128


# -------------------------- Pallas kernel (hot path) --------------------------

def _equi_critic_kernel(obs_ref, act_ref, wt_ref, w1_ref, w2_ref, w3_ref,
                        bias_ref, q_ref, *, cf, nh, seg):
    # Packed biases: [0:cf]=trunk shift, [seg:seg+nh]=b1, [2seg:2seg+nh]=b2,
    # [3seg:3seg+128]=lane-dense-padded b3 (cols >= 2 are zero).
    shift = bias_ref[:, 0:cf]
    b1 = bias_ref[:, seg:seg + nh]
    b2 = bias_ref[:, 2 * seg:2 * seg + nh]
    b3 = bias_ref[:, 3 * seg:3 * seg + LANE]

    # Trunk: equivariant 1x1 conv with BN(eval) + bias pre-folded into the weight, then tanh.
    # bf16 MXU operands, f32 accumulation / elementwise (EUP tanh, VPU adds stay f32).
    h = jnp.tanh(jnp.dot(obs_ref[...], wt_ref[...],
                         preferred_element_type=jnp.float32) + shift)

    # tensor_directsum([h, act]) followed by the fused Q1+Q2 first layer as ONE matmul:
    # W1 rows for h and act are stacked host-side, so concat + single MXU push.
    ha = jnp.concatenate([h.astype(jnp.bfloat16), act_ref[...]], axis=-1)
    z1 = jnp.dot(ha, w1_ref[...], preferred_element_type=jnp.float32) + b1
    z1 = jnp.maximum(z1, 0.0).astype(jnp.bfloat16)

    z2 = jnp.dot(z1, w2_ref[...], preferred_element_type=jnp.float32) + b2   # block-diag W2
    z2 = jnp.maximum(z2, 0.0).astype(jnp.bfloat16)

    # W3 zero-padded to 128 output lanes (col 0 = q1, col 1 = q2) -> lane-dense store.
    q_ref[...] = jnp.dot(z2, w3_ref[...], preferred_element_type=jnp.float32) + b3


def _obs_block_spec(tb, cin):
    # 3-deep buffering on the obs stream (main v5e win); fall back if unsupported.
    if hasattr(pl, "Buffered"):
        try:
            return pl.BlockSpec((tb, cin), lambda i: (i, 0), pipeline_mode=pl.Buffered(3))
        except TypeError:
            pass
    return pl.BlockSpec((tb, cin), lambda i: (i, 0))


def equi_critic_forward(obs_flat, act_regular, fused, *, block_b=128):
    B, cin = obs_flat.shape
    ca = act_regular.shape[1]
    kernel = functools.partial(_equi_critic_kernel,
                               cf=fused["cf"], nh=fused["nh"], seg=fused["seg"])

    weights = (fused["wt"], fused["w1"], fused["w2"], fused["w3"], fused["bias"])
    obs_bf = obs_flat.astype(jnp.bfloat16)
    act_bf = act_regular.astype(jnp.bfloat16)

    use_grid = (block_b is not None) and (B > block_b) and (B % block_b == 0)
    if use_grid:
        tb = block_b
        in_specs = [
            _obs_block_spec(tb, cin),
            pl.BlockSpec((tb, ca), lambda i: (i, 0)),
        ]
        # Constant block index => weights/bias stay resident in VMEM (no per-step re-DMA).
        in_specs += [pl.BlockSpec(w.shape, lambda i: (0, 0)) for w in weights]
        out_spec = pl.BlockSpec((tb, LANE), lambda i: (i, 0))
        q_pad = pl.pallas_call(
            kernel,
            out_shape=jax.ShapeDtypeStruct((B, LANE), jnp.float32),
            grid_spec=pltpu.PrefetchScalarGridSpec(
                num_scalar_prefetch=0, grid=(B // tb,),
                in_specs=in_specs, out_specs=out_spec),
            compiler_params=pltpu.CompilerParams(
                dimension_semantics=("parallel",)),   # v7x: split batch over 2 TCs
        )(obs_bf, act_bf, *weights)
    else:
        # Tiny-batch path: whole problem is a few KiB, one block resident in VMEM.
        vmem = pl.BlockSpec(memory_space=pltpu.MemorySpace.VMEM)
        q_pad = pl.pallas_call(
            kernel,
            out_shape=jax.ShapeDtypeStruct((B, LANE), jnp.float32),
            in_specs=[vmem] * (2 + len(weights)),
            out_specs=vmem,
        )(obs_bf, act_bf, *weights)

    return q_pad[:, 0:1], q_pad[:, 1:2]


# --------------------- deterministic, C2-equivariant params -------------------

def _regular_perm(n_fields):
    # C2 regular repr: the nontrivial group element swaps the 2 channels of each field.
    return np.arange(2 * n_fields).reshape(-1, 2)[:, ::-1].reshape(-1)


def _symmetrize(w, perm_out, perm_in):
    # Project a random 1x1-conv matrix onto the C2-equivariant subspace: W = (W + P_out W P_in)/2
    w = np.asarray(w, dtype=np.float32)
    w2 = w[perm_out][:, perm_in] if perm_out is not None else w[:, perm_in]
    return 0.5 * (w + w2)


def make_params(key, repr_dim, feature_dim, hidden_dim, action_dim):
    """Logical (un-fused) f32 parameters, identical in meaning to the PyTorch module."""
    cin, cf, ca, ch = 2 * repr_dim, 2 * feature_dim, 2 * action_dim, 2 * hidden_dim
    p_in, p_f, p_a, p_h = (_regular_perm(repr_dim), _regular_perm(feature_dim),
                           _regular_perm(action_dim), _regular_perm(hidden_dim))
    p_fa = np.concatenate([p_f, p_a + cf])

    ks = jax.random.split(key, 8)
    std = 0.1

    def rnd(k, shape):
        return np.asarray(std * jax.random.normal(k, shape, jnp.float32), dtype=np.float32)

    # trunk R2Conv(in_type -> feat_type, kernel 1): weight (cf, cin), per-field bias
    wt = _symmetrize(rnd(ks[0], (cf, cin)), p_f, p_in)
    bt = np.repeat(rnd(ks[1], (feature_dim,)), 2)

    # InnerBatchNorm (eval): per-field running stats + affine broadcast over the 2 channels.
    gamma = 1.0 + 0.05 * np.asarray(jax.random.normal(ks[2], (feature_dim,), jnp.float32))
    beta = 0.05 * np.asarray(jax.random.normal(ks[3], (feature_dim,), jnp.float32))
    mean = 0.01 * np.asarray(jax.random.normal(ks[4], (feature_dim,), jnp.float32))
    var = 1.0 + 0.05 * np.abs(np.asarray(jax.random.normal(ks[5], (feature_dim,), jnp.float32)))
    eps = 1e-5
    scale_f = (gamma / np.sqrt(var + eps)).astype(np.float32)
    shift_f = (beta - mean * scale_f).astype(np.float32)

    def q_head(keys):
        w1 = _symmetrize(rnd(keys[0], (ch, cf + ca)), p_h, p_fa)
        b1 = np.repeat(rnd(keys[1], (hidden_dim,)), 2)
        w2 = _symmetrize(rnd(keys[2], (ch, ch)), p_h, p_h)
        b2 = np.repeat(rnd(keys[3], (hidden_dim,)), 2)
        w3 = _symmetrize(rnd(keys[4], (1, ch)), None, p_h)   # trivial output field
        b3 = rnd(keys[5], (1,))
        return dict(
            w1h=jnp.asarray(w1[:, :cf].T, jnp.float32),
            w1a=jnp.asarray(w1[:, cf:].T, jnp.float32),
            b1=jnp.asarray(b1, jnp.float32)[None, :],
            w2=jnp.asarray(w2.T, jnp.float32),
            b2=jnp.asarray(b2, jnp.float32)[None, :],
            w3=jnp.asarray(w3.T, jnp.float32),
            b3=jnp.asarray(b3, jnp.float32)[None, :],
        )

    params = dict(
        wt=jnp.asarray(wt.T, jnp.float32),
        bt=jnp.asarray(bt, jnp.float32)[None, :],
        bn_scale=jnp.asarray(np.repeat(scale_f, 2), jnp.float32)[None, :],
        bn_shift=jnp.asarray(np.repeat(shift_f, 2), jnp.float32)[None, :],
    )
    for name, d in (("q1", q_head(jax.random.split(ks[6], 6))),
                    ("q2", q_head(jax.random.split(ks[7], 6)))):
        for k, v in d.items():
            params[f"{name}_{k}"] = v
    return params


def pack_fused_params(p):
    """Host-side fusion: fold BN into trunk weight, fuse Q1/Q2, stack W1, lane-pad W3/biases."""
    cin, cf = p["wt"].shape
    ca = p["q1_w1a"].shape[0]
    ch = p["q1_w2"].shape[0]
    nh = 2 * ch
    seg = 128 * ((max(cf, nh, LANE) + 127) // 128)   # lane-128-aligned bias segment width

    # trunk: h = tanh((obs@wt + bt)*s + b) == tanh(obs@(wt*s) + (bt*s + b))
    wt_folded = (p["wt"] * p["bn_scale"]).astype(jnp.bfloat16)
    shift = p["bt"] * p["bn_scale"] + p["bn_shift"]

    # Fused first layer: rows for h then act, columns = [Q1 | Q2] -> (cf+ca, nh).
    w1h = jnp.concatenate([p["q1_w1h"], p["q2_w1h"]], axis=1)
    w1a = jnp.concatenate([p["q1_w1a"], p["q2_w1a"]], axis=1)
    w1 = jnp.concatenate([w1h, w1a], axis=0).astype(jnp.bfloat16)

    # Block-diagonal second layer (nh, nh).
    w2 = jnp.zeros((nh, nh), jnp.float32)
    w2 = w2.at[:ch, :ch].set(p["q1_w2"]).at[ch:, ch:].set(p["q2_w2"])

    # Third layer zero-padded to 128 output lanes: col 0 = q1, col 1 = q2 (lane-dense store).
    w3 = jnp.zeros((nh, LANE), jnp.float32)
    w3 = w3.at[:ch, 0:1].set(p["q1_w3"]).at[ch:, 1:2].set(p["q2_w3"])

    bias = jnp.zeros((1, 4 * seg), jnp.float32)
    bias = bias.at[:, 0:cf].set(shift)
    bias = bias.at[:, seg:seg + nh].set(jnp.concatenate([p["q1_b1"], p["q2_b1"]], axis=1))
    bias = bias.at[:, 2 * seg:2 * seg + nh].set(
        jnp.concatenate([p["q1_b2"], p["q2_b2"]], axis=1))
    bias = bias.at[:, 3 * seg:3 * seg + 2].set(
        jnp.concatenate([p["q1_b3"], p["q2_b3"]], axis=1))

    return dict(wt=wt_folded, w1=w1,
                w2=w2.astype(jnp.bfloat16), w3=w3.astype(jnp.bfloat16),
                bias=bias, cf=int(cf), nh=int(nh), seg=int(seg))


# ------------------------------ pure-JAX reference ----------------------------

def reference_forward(obs_flat, act_regular, p):
    mm = lambda a, b: jnp.dot(a, b, precision=jax.lax.Precision.HIGHEST)
    h = jnp.tanh((mm(obs_flat, p["wt"]) + p["bt"]) * p["bn_scale"] + p["bn_shift"])

    def head(pref):
        z1 = jnp.maximum(mm(h, p[pref + "_w1h"]) + mm(act_regular, p[pref + "_w1a"])
                         + p[pref + "_b1"], 0.0)
        z2 = jnp.maximum(mm(z1, p[pref + "_w2"]) + p[pref + "_b2"], 0.0)
        return mm(z2, p[pref + "_w3"]) + p[pref + "_b3"]

    return head("q1"), head("q2")


# ------------------------------------ main -------------------------------------

if __name__ == "__main__":
    # Small, forward-consistent sizes (C2 group => every regular field is 2 channels)
    repr_dim, feature_dim, hidden_dim, action_dim = 16, 16, 32, 2

    key = jax.random.PRNGKey(0)
    k_obs, k_act, k_par, k_obs2, k_act2 = jax.random.split(key, 5)

    params = make_params(k_par, repr_dim, feature_dim, hidden_dim, action_dim)
    fused = pack_fused_params(params)

    def prepare(k_o, k_a, batch):
        # PyTorch-style NCHW obs with H=W=1 (what `self.first` produces)
        obs_nchw = jax.random.normal(k_o, (batch, 2 * repr_dim, 1, 1), jnp.float32)
        action = jax.random.normal(k_a, (batch, action_dim), jnp.float32)
        # Glue (mirrors `self.first` and the C2 action lift): flatten obs; act = stack([a,-a],-1)
        obs_flat = obs_nchw.reshape(batch, -1)
        act_regular = jnp.stack([action, -action], axis=-1).reshape(batch, -1)
        return obs_flat, act_regular

    rtol, atol = 5e-2, 1e-2   # bf16 MXU operands vs HIGHEST-precision f32 reference

    # 1) Tiny batch -> single-block, gridless path.
    B = 8
    obs_flat, act_regular = prepare(k_obs, k_act, B)
    q1, q2 = equi_critic_forward(obs_flat, act_regular, fused, block_b=128)
    jax.block_until_ready((q1, q2))
    r1, r2 = reference_forward(obs_flat, act_regular, params)
    np.testing.assert_allclose(np.asarray(q1), np.asarray(r1), rtol=rtol, atol=atol)
    np.testing.assert_allclose(np.asarray(q2), np.asarray(r2), rtol=rtol, atol=atol)
    assert q1.shape == (B, 1) and q2.shape == (B, 1)

    # 2) Larger batch -> batch-gridded, software-pipelined path (4 grid steps of TB=128,
    #    "parallel" batch axis for v7x's two TensorCores).
    B2 = 512
    obs2, act2 = prepare(k_obs2, k_act2, B2)
    q1g, q2g = equi_critic_forward(obs2, act2, fused, block_b=128)
    jax.block_until_ready((q1g, q2g))
    r1g, r2g = reference_forward(obs2, act2, params)
    np.testing.assert_allclose(np.asarray(q1g), np.asarray(r1g), rtol=rtol, atol=atol)
    np.testing.assert_allclose(np.asarray(q2g), np.asarray(r2g), rtol=rtol, atol=atol)
    assert q1g.shape == (B2, 1) and q2g.shape == (B2, 1)

    print("KERNEL_OK")
</pallas_src>

<mosaic_0001>
module attributes {stable_mosaic.version = 11 : i64} {
  func.func @_equi_critic_kernel(%arg0: memref<8x32xbf16, #tpu.memory_space<vmem>>, %arg1: memref<8x4xbf16, #tpu.memory_space<vmem>>, %arg2: memref<32x32xbf16, #tpu.memory_space<vmem>>, %arg3: memref<36x128xbf16, #tpu.memory_space<vmem>>, %arg4: memref<128x128xbf16, #tpu.memory_space<vmem>>, %arg5: memref<128x128xbf16, #tpu.memory_space<vmem>>, %arg6: memref<1x512xf32, #tpu.memory_space<vmem>>, %arg7: memref<8x128xf32, #tpu.memory_space<vmem>>) attributes {dimension_semantics = [], scalar_prefetch = 0 : i64, scratch_operands = 0 : i64, tpu.core_type = #tpu.core_type<tc>} {
    %c0 = arith.constant 0 : index
    %c0_0 = arith.constant 0 : index
    %0 = vector.load %arg6[%c0, %c0_0] : memref<1x512xf32, #tpu.memory_space<vmem>>, vector<1x32xf32>
    %c0_1 = arith.constant 0 : index
    %c128 = arith.constant 128 : index
    %1 = vector.load %arg6[%c0_1, %c128] : memref<1x512xf32, #tpu.memory_space<vmem>>, vector<1x128xf32>
    %c0_2 = arith.constant 0 : index
    %c256 = arith.constant 256 : index
    %2 = vector.load %arg6[%c0_2, %c256] : memref<1x512xf32, #tpu.memory_space<vmem>>, vector<1x128xf32>
    %c0_3 = arith.constant 0 : index
    %c384 = arith.constant 384 : index
    %3 = vector.load %arg6[%c0_3, %c384] : memref<1x512xf32, #tpu.memory_space<vmem>>, vector<1x128xf32>
    %c0_4 = arith.constant 0 : index
    %c0_5 = arith.constant 0 : index
    %4 = vector.load %arg0[%c0_4, %c0_5] : memref<8x32xbf16, #tpu.memory_space<vmem>>, vector<8x32xbf16>
    %c0_6 = arith.constant 0 : index
    %c0_7 = arith.constant 0 : index
    %5 = vector.load %arg2[%c0_6, %c0_7] : memref<32x32xbf16, #tpu.memory_space<vmem>>, vector<32x32xbf16>
    %cst = arith.constant dense<0.000000e+00> : vector<8x32xf32>
    %6 = tpu.matmul %4, %5, %cst {dimension_numbers = #tpu.dot_dimension_numbers<[1], [0], [0], [1], [0, 0, 1, 1], [], []>} : vector<8x32xbf16>, vector<32x32xbf16>, vector<8x32xf32> -> vector<8x32xf32>
    %7 = vector.broadcast %0 : vector<1x32xf32> to vector<8x32xf32>
    %8 = arith.addf %6, %7 : vector<8x32xf32>
    %9 = math.tanh %8 : vector<8x32xf32>
    %10 = arith.truncf %9 : vector<8x32xf32> to vector<8x32xbf16>
    %c0_8 = arith.constant 0 : index
    %c0_9 = arith.constant 0 : index
    %11 = vector.load %arg1[%c0_8, %c0_9] : memref<8x4xbf16, #tpu.memory_space<vmem>>, vector<8x4xbf16>
    %12 = tpu.concatenate %10, %11 in 1 : vector<8x32xbf16>, vector<8x4xbf16> -> vector<8x36xbf16>
    %c0_10 = arith.constant 0 : index
    %c0_11 = arith.constant 0 : index
    %13 = vector.load %arg3[%c0_10, %c0_11] : memref<36x128xbf16, #tpu.memory_space<vmem>>, vector<36x128xbf16>
    %cst_12 = arith.constant dense<0.000000e+00> : vector<8x128xf32>
    %14 = tpu.matmul %12, %13, %cst_12 {dimension_numbers = #tpu.dot_dimension_numbers<[1], [0], [0], [1], [0, 0, 1, 1], [], []>} : vector<8x36xbf16>, vector<36x128xbf16>, vector<8x128xf32> -> vector<8x128xf32>
    %15 = vector.broadcast %1 : vector<1x128xf32> to vector<8x128xf32>
    %16 = arith.addf %14, %15 : vector<8x128xf32>
    %cst_13 = arith.constant 0.000000e+00 : f32
    %17 = vector.broadcast %cst_13 : f32 to vector<8x128xf32>
    %18 = arith.maximumf %16, %17 : vector<8x128xf32>
    %19 = arith.truncf %18 : vector<8x128xf32> to vector<8x128xbf16>
    %c0_14 = arith.constant 0 : index
    %c0_15 = arith.constant 0 : index
    %20 = vector.load %arg4[%c0_14, %c0_15] : memref<128x128xbf16, #tpu.memory_space<vmem>>, vector<128x128xbf16>
    %cst_16 = arith.constant dense<0.000000e+00> : vector<8x128xf32>
    %21 = tpu.matmul %19, %20, %cst_16 {dimension_numbers = #tpu.dot_dimension_numbers<[1], [0], [0], [1], [0, 0, 1, 1], [], []>} : vector<8x128xbf16>, vector<128x128xbf16>, vector<8x128xf32> -> vector<8x128xf32>
    %22 = vector.broadcast %2 : vector<1x128xf32> to vector<8x128xf32>
    %23 = arith.addf %21, %22 : vector<8x128xf32>
    %cst_17 = arith.constant 0.000000e+00 : f32
    %24 = vector.broadcast %cst_17 : f32 to vector<8x128xf32>
    %25 = arith.maximumf %23, %24 : vector<8x128xf32>
    %26 = arith.truncf %25 : vector<8x128xf32> to vector<8x128xbf16>
    %c0_18 = arith.constant 0 : index
    %c0_19 = arith.constant 0 : index
    %27 = vector.load %arg5[%c0_18, %c0_19] : memref<128x128xbf16, #tpu.memory_space<vmem>>, vector<128x128xbf16>
    %cst_20 = arith.constant dense<0.000000e+00> : vector<8x128xf32>
    %28 = tpu.matmul %26, %27, %cst_20 {dimension_numbers = #tpu.dot_dimension_numbers<[1], [0], [0], [1], [0, 0, 1, 1], [], []>} : vector<8x128xbf16>, vector<128x128xbf16>, vector<8x128xf32> -> vector<8x128xf32>
    %29 = vector.broadcast %3 : vector<1x128xf32> to vector<8x128xf32>
    %30 = arith.addf %28, %29 : vector<8x128xf32>
    %c0_21 = arith.constant 0 : index
    %c0_22 = arith.constant 0 : index
    %31 = vector.load %arg7[%c0_21, %c0_22] : memref<8x128xf32, #tpu.memory_space<vmem>>, vector<8x128xf32>
    tpu.vector_store %arg7[%c0_21, %c0_22], %30 {strides = array<i32>} : memref<8x128xf32, #tpu.memory_space<vmem>>, vector<8x128xf32>,
    return
  }
}

</mosaic_0001>

<bundles_post_ra>
// kernel: tpu_custom_call.1
= control target key start
LH: loop header
LB: loop body
LE: loop exit
PB: predicated region body
PF: predicated region fallthrough
CT: control target
= control target key end

     0   :  { %12 = vsyncpa [#allocation3], 0  ;;  %s697_s0 = inlined_call_operand.vmem [shape: bf16[8,32], index: 0, kind: input, shape index: {}]   ;;  %s698_s1 = inlined_call_operand.vmem [shape: bf16[8,4], index: 1, kind: input, shape index: {}]   ;;  %s699_s2 = inlined_call_operand.hbm [shape: bf16[32,32], index: 2, kind: input, shape index: {}]   ;;  %s700_s3 = inlined_call_operand.hbm [shape: bf16[36,128], index: 3, kind: input, shape index: {}]   ;;  %s701_s4 = inlined_call_operand.hbm [shape: bf16[128,128], index: 4, kind: input, shape index: {}]   ;;  %s702_s5 = inlined_call_operand.hbm [shape: bf16[128,128], index: 5, kind: input, shape index: {}]   ;;  %s703_s6 = inlined_call_operand.vmem [shape: f32[1,512], index: 6, kind: input, shape index: {}]   ;;  %s704_s7 = inlined_call_operand.hbm [shape: f32[8,128], index: 7, kind: output, shape index: {}]  }
   0x1   :  { %13 = vsyncpa [#allocation6], 0 }
   0x2   :  { %14 = vsyncpa [#allocation9], 0 }
   0x3   :  { %15 = vsyncpa [#allocation4], 0  ;;  %s37_s26 = sshll.u32 %s700_s3, 4  ;;  %s614_s27 = smov [#allocation5]   ;;  %s38_s26 = int_to_ptr.hbm [resolvable:$true] %s37_s26 }
   0x4   :  { %s39_s28 = sshll.u32 %s614_s27, 4  ;;  %s24_s8 = sshll.u32 %s699_s2, 4  ;;  %s40_s28 = int_to_ptr.vmem [resolvable:$true] %s39_s28  ;;  %s25_s8 = int_to_ptr.hbm [resolvable:$true] %s24_s8 }
   0x5   :  { %s615_s9 = smov 64   ;;  %s616_s10 = smov 4  }
   0x6   :  { %45 = dma.hbm_to_vmem [thread:$0]  %s38_s26, 320, %s40_s28, [#allocation6], %s615_s9, %s615_s9, %s616_s10  }
   0x7   :  { %s617_s11 = smov [#allocation2]   ;;  %s50_s15 = sshll.u32 %s701_s4, 4  ;;  %s51_s15 = int_to_ptr.hbm [resolvable:$true] %s50_s15 }
   0x8   :  { %s26_s12 = sshll.u32 %s617_s11, 4  ;;  %s63_s17 = sshll.u32 %s702_s5, 4  ;;  %s27_s12 = int_to_ptr.vmem [resolvable:$true] %s26_s12  ;;  %s64_s17 = int_to_ptr.hbm [resolvable:$true] %s63_s17 }
   0x9   :  { %32 = dma.hbm_to_vmem [thread:$0]  %s25_s8, 256, %s27_s12, [#allocation3], %s615_s9, %s615_s9, %s616_s10  }
   0xa   :  { %s618_s18 = smov [#allocation7]   ;;  %s619_s2 = smov [#allocation8]  }
   0xb   :  { %s52_s19 = sshll.u32 %s618_s18, 4  ;;  %s65_s20 = sshll.u32 %s619_s2, 4  ;;  %s53_s19 = int_to_ptr.vmem [resolvable:$true] %s52_s19  ;;  %s66_s20 = int_to_ptr.vmem [resolvable:$true] %s65_s20 }
   0xc   :  { %58 = dma.hbm_to_vmem [thread:$0]  %s51_s15, 1024, %s53_s19, [#allocation6], %s615_s9, %s615_s9, %s616_s10  }
   0xd   :  { %71 = dma.hbm_to_vmem [thread:$0]  %s64_s17, 1024, %s66_s20, [#allocation9], %s615_s9, %s615_s9, %s616_s10  }
   0xe   :  { %606 = dma.done.wait [#allocation3], 256  }
   0xf   :  { %607 = vsyncadd [#allocation3], 4294967040 }
  0x10   :  { %608 = dma.done.wait [#allocation6], 1344  }
  0x11   :  { %609 = vsyncadd [#allocation6], 4294965952 }
  0x12   :  { %610 = dma.done.wait [#allocation9], 1024  }
  0x13   :  { %611 = vsyncadd [#allocation9], 4294966272  ;;  %v453_v0 = vld [vmem:[#allocation2 + $0x8] sm:$0xff]  ;;  %v452_v1 = vld [vmem:[#allocation2] sm:$0xff]  ;;  %vm115_vm0 = vcmask 261120   ;;  %s620_s23 = smov 32  }
  0x14   :  { %v134_v2 = vld [vmem:[%s698_s1] sm:$0xf]  ;;  %125 = vmatpush.bf16.msra.mxu0 %v453_v0  ;;  %vm169_vm1 = vcmask 1041408   ;;  %v455_v10 = vld [vmem:[#allocation5 + $0x8] sm:$0xff]  ;;  %v454_v11 = vld [vmem:[#allocation5] sm:$0xff]  ;;  %vm166_vm2 = vcmask 293888  }
  0x15   :  { %v136_v3 = vunpack.c.l.b16 %v134_v2  ;;  %v95_v5 = vld [vmem:[%s697_s0] sm:$0xf]  ;;  %v462_v13 = vld [vmem:[#allocation7 + $0x30] sm:$0xff]  ;;  %v461_v14 = vld [vmem:[#allocation7 + $0x28] sm:$0xff]  ;;  %s621_s30 = smov [#allocation10]   ;;  %s358_s11 = sshll.u32 %s704_s7, 4  ;;  %s359_s11 = int_to_ptr.hbm [resolvable:$true] %s358_s11 }
  0x16   :  { %v147_v6 = vld [vmem:[#allocation5 + $0x10] sm:$0x3]  ;;  %v460_v15 = vld [vmem:[#allocation7 + $0x20] sm:$0xff]  ;;  %v458_v18 = vld [vmem:[#allocation7 + $0x10] sm:$0xff]  ;;  %s356_s8 = sshll.u32 %s621_s30, 4  ;;  %s357_s8 = int_to_ptr.vmem [resolvable:$true] %s356_s8 }
  0x17   :  { %v137_v4 = vpack.c.b16 %v136_v3, %v136_v3  ;;  %v160_v7 = vunpack.c.l.b16 %v147_v6  ;;  %v463_v12 = vld [vmem:[#allocation7 + $0x38] sm:$0xff]  ;;  %v457_v26 = vld [vmem:[#allocation7 + $0x8] sm:$0xff]  ;;  %v456_v27 = vld [vmem:[#allocation7] sm:$0xff] }
  0x18   :  { %126 = vmatpush.bf16.msra.mxu0 %v452_v1  ;;  %255 = vmatpush.bf16.msra.mxu2 %v463_v12  ;;  %v459_v16 = vld [vmem:[#allocation7 + $0x18] sm:$0xff]  ;;  %v470_v29 = vld [vmem:[#allocation8 + $0x30] sm:$0xff]  ;;  %v469_v30 = vld [vmem:[#allocation8 + $0x28] sm:$0xff] }
  0x19   :  { %138 = vrot.lane.b32.xlu0 %v137_v4, %s620_s23  ;;  %v163_v8 = vpack.c.b16 %v160_v7, %v160_v7  ;;  %v480_v17 = vld [vmem:[%s703_s6] ss:$0 sm:$0xff]  ;;  %v468_v31 = vld [vmem:[#allocation8 + $0x20] sm:$0xff]  ;;  %v466_v33 = vld [vmem:[#allocation8 + $0x10] sm:$0xff] }
  0x1a   :  { %v471_v28 = vld [vmem:[#allocation8 + $0x38] sm:$0xff]  ;;  %v465_v40 = vld [vmem:[#allocation8 + $0x8] sm:$0xff]  ;;  %v464_v41 = vld [vmem:[#allocation8] sm:$0xff] }
  0x1b   :  { %378 = vmatmul.msk.bf16.vlgmr.msra.gmra.mxu0 %vm115_vm0, %v95_v5  ;;  %v171_v9 = vsel %vm169_vm1, %v163_v8, 0  ;;  %337 = vmatpush.bf16.msra.mxu3 %v471_v28  ;;  %v467_v32 = vld [vmem:[#allocation8 + $0x18] sm:$0xff] }
  0x1c   :  { %178 = vmatpush.bf16.msra.mxu1 %v171_v9  ;;  %256 = vmatpush.bf16.msra.mxu2 %v462_v13  ;;  %v481_v34 = vld [vmem:[%s703_s6 + $0x1] ss:$0 sm:$0xff]  ;;  %v482_v42 = vld [vmem:[%s703_s6 + $0x2] ss:$0 sm:$0xff]  ;;  %v483_v48 = vld [vmem:[%s703_s6 + $0x3] ss:$0 sm:$0xff] }
  0x1f   :  { %338 = vmatpush.bf16.msra.mxu3 %v470_v29 }
  0x20   :  { %179 = vmatpush.bf16.msra.mxu1 %v455_v10  ;;  %257 = vmatpush.bf16.msra.mxu2 %v461_v14 }
  0x23   :  { %339 = vmatpush.bf16.msra.mxu3 %v469_v30 }
  0x24   :  { %180 = vmatpush.bf16.msra.mxu1 %v454_v11  ;;  %258 = vmatpush.bf16.msra.mxu2 %v460_v15 }
  0x27   :  { %340 = vmatpush.bf16.msra.mxu3 %v468_v31 }
  0x28   :  { %259 = vmatpush.bf16.msra.mxu2 %v459_v16 }
  0x2b   :  { %341 = vmatpush.bf16.msra.mxu3 %v467_v32 }
  0x2c   :  { %260 = vmatpush.bf16.msra.mxu2 %v458_v18 }
  0x2f   :  { %342 = vmatpush.bf16.msra.mxu3 %v466_v33 }
  0x30   :  { %261 = vmatpush.bf16.msra.mxu2 %v457_v26 }
  0x33   :  { %343 = vmatpush.bf16.msra.mxu3 %v465_v40 }
  0x34   :  { %262 = vmatpush.bf16.msra.mxu2 %v456_v27 }
  0x37   :  { %344 = vmatpush.bf16.msra.mxu3 %v464_v41 }
  0x8b   :  { %v139_v23 = vpop.permute.xlu0 %138 }
  0x98   :  { %v128_v19 = vpop.f32.mrf.mxu0 }
  0x99   :  { %v129_v20 = vadd.f32 %v480_v17, %v128_v19 }
  0x9b   :  { %484 = vtanh.f32 %v129_v20 }
  0xa0   :  { %v130_v21 = vpop.f32.mrf.mxu0 }
  0xa1   :  { %v485_v22 = vpop.eup %484 }
  0xa2   :  { %v133_v24 = vpack.c.bf16 %v485_v22, %v485_v22 }
  0xa4   :  { %v142_v25 = vsel %vm115_vm0, %v133_v24, %v139_v23 }
  0xa5   :  { %387 = vmatmul.msk.bf16.vlgmr.msra.gmra.mxu1 %vm166_vm2, %v142_v25 }
 0x122   :  { %v182_v35 = vpop.f32.mrf.mxu1 }
 0x123   :  { %v183_v36 = vadd.f32 %v481_v34, %v182_v35 }
 0x125   :  { %v186_v37 = vmax.f32 %v183_v36, 0.0 }
 0x127   :  { %v187_v38 = vpack.c.bf16 %v186_v37, %v186_v37 }
 0x129   :  { %263 = vmatmul.bf16.vlgmr.msra.gmra.mxu2 %v187_v38 }
 0x12a   :  { %v184_v39 = vpop.f32.mrf.mxu1 }
 0x1ac   :  { %v264_v43 = vpop.f32.mrf.mxu2 }
 0x1ad   :  { %v265_v44 = vadd.f32 %v482_v42, %v264_v43 }
 0x1af   :  { %v268_v45 = vmax.f32 %v265_v44, 0.0 }
 0x1b1   :  { %v269_v46 = vpack.c.bf16 %v268_v45, %v268_v45 }
 0x1b3   :  { %345 = vmatmul.bf16.vlgmr.msra.gmra.mxu3 %v269_v46 }
 0x1b4   :  { %v266_v47 = vpop.f32.mrf.mxu2 }
 0x236   :  { %v346_v49 = vpop.f32.mrf.mxu3 }
 0x237   :  { %v347_v50 = vadd.f32 %v483_v48, %v346_v49 }
 0x239   :  { %350 = vst [vmem:[#allocation10] sm:$0xff] %v347_v50 }
 0x23a   :  { %361 = dma.vmem_to_hbm [thread:$0]  %s357_s8, 128, %s359_s11, [#allocation4]  }
 0x23e   :  { %v348_v51 = vpop.f32.mrf.mxu3 }
 0x23f   :  { %612 = dma.done.wait [#allocation4], 128  }
 0x240   :  { %613 = vsyncadd [#allocation4], 4294967168 }
 0x241   :  { %366 = vsyncpa [#allocation3], 1 }
 0x242   :  { %367 = vsyncpa [#allocation6], 1 }
 0x243   :  { %368 = vsyncpa [#allocation9], 1 }
 0x244   :  { %369 = vsyncpa [#allocation4], 1 }

</bundles_post_ra>
